<compile_context>
chip_gen: v7x
topology: tpu7x:2x2x1
jax: 0.10.0
libtpu: 0.0.40
codegen_flags: <defaults>
</compile_context>

<pallas_src>
import functools

import jax
import jax.numpy as jnp
from jax.experimental import pallas as pl
from jax.experimental.pallas import tpu as pltpu


def _round_up(v, m):
    return ((v + m - 1) // m) * m


def _vmem_limit_bytes():
    """Scoped-VMEM limit derived from the chip's physical VMEM capacity."""
    cap = 64 << 20                      # conservative fallback (v7x per-core VMEM)
    try:
        info = pltpu.get_tpu_info()
        cap = int(getattr(info, "vmem_capacity_bytes", cap))
    except Exception:
        pass
    return int(min(cap * 3 // 4, 96 << 20))


def _pick_batch_tile(B, per_batch_bytes, target_bytes):
    """Largest divisor-of-B tile whose block stays under target_bytes, while
    keeping >=4 grid steps (>=2 per TensorCore on a v7x megacore) when B
    allows, or >=2 steps when B >= 2."""
    bt = max(1, min(B, target_bytes // max(per_batch_bytes, 1)))
    if B >= 4:
        bt = min(bt, B // 4)
    elif B >= 2:
        bt = min(bt, B // 2)
    bt = max(bt, 1)
    while B % bt:
        bt -= 1
    return bt


def _chunked_lane_sum(x_ref, chunk, base=None, hw_true=None):
    """f32 sum over the lane (last) axis of x_ref, read in lane chunks so no
    full-block f32 temp is materialized.  If base/hw_true are given, lanes
    with global spatial index >= hw_true are masked out (ragged HW tail)."""
    bt, c, hw_blk = x_ref.shape
    acc = jnp.zeros((bt, c), jnp.float32)
    start = 0
    while start < hw_blk:
        size = min(chunk, hw_blk - start)
        xc = x_ref[:, :, start:start + size].astype(jnp.float32)
        if hw_true is not None:
            lane = jax.lax.broadcasted_iota(jnp.int32, (bt, c, size), 2)
            xc = jnp.where(base + (start + lane) < hw_true, xc, 0.0)
        acc = acc + jnp.sum(xc, axis=2)
        start += size
    return acc


def _mlp_sigmoid(avg_f32, w1t_ref, b1_ref, w2t_ref, b2_ref):
    """(bt, C) f32 pooled means -> (bt, C) f32 sigmoid gate (MXU matmuls)."""
    a = avg_f32.astype(w1t_ref.dtype)
    h = jnp.dot(a, w1t_ref[...], preferred_element_type=jnp.float32) + b1_ref[...]
    h = jnp.maximum(h, 0.0).astype(w2t_ref.dtype)
    y = jnp.dot(h, w2t_ref[...], preferred_element_type=jnp.float32) + b2_ref[...]
    return jax.nn.sigmoid(y)


# ----------------------------- fused (single-pass) ---------------------------


def _ca_fused_kernel(x_ref, w1t_ref, b1_ref, w2t_ref, b2_ref, o_ref, *, chunk):
    # x_ref / o_ref: (bt, C, HW) with the FULL spatial axis resident.
    hw = x_ref.shape[2]
    s = _chunked_lane_sum(x_ref, chunk)                  # (bt, C) f32
    avg = s * (1.0 / hw)
    y = _mlp_sigmoid(avg, w1t_ref, b1_ref, w2t_ref, b2_ref)   # (bt, C) f32
    # Channel-wise scaling, streamed in the input dtype (broadcast over lanes).
    scale = y.astype(o_ref.dtype)[:, :, None]
    o_ref[...] = x_ref[...] * scale


# --------------------------- two-phase (large slabs) --------------------------


def _ca_pool_mlp_kernel(x_ref, w1t_ref, b1_ref, w2t_ref, b2_ref, s_ref, acc_ref,
                        *, hw_true, chunk):
    # x_ref: (1, C, hw_tile); s_ref: (1, 1, C) gate; acc_ref: (1, C) f32 scratch.
    hstep = pl.program_id(1)
    hw_tile = x_ref.shape[2]

    @pl.when(hstep == 0)
    def _():
        acc_ref[...] = jnp.zeros_like(acc_ref)

    if hw_true % hw_tile:                                  # static decision
        part = _chunked_lane_sum(x_ref, chunk, base=hstep * hw_tile,
                                 hw_true=hw_true)
    else:
        part = _chunked_lane_sum(x_ref, chunk)
    acc_ref[...] += part

    @pl.when(hstep == pl.num_programs(1) - 1)
    def _():
        avg = acc_ref[...] * (1.0 / hw_true)
        y = _mlp_sigmoid(avg, w1t_ref, b1_ref, w2t_ref, b2_ref)   # (1, C)
        s_ref[...] = y[None].astype(s_ref.dtype)                  # (1, 1, C)


def _ca_scale_kernel(x_ref, s_ref, o_ref):
    # x_ref/o_ref: (1, C, hw_tile); s_ref: (1, C, 1) gate, broadcast over lanes.
    o_ref[...] = x_ref[...] * s_ref[...].astype(o_ref.dtype)


# ---------------------------------- wrapper -----------------------------------


def ca_layer_pallas(x, w1, b1, w2, b2, *, _force_two_phase=False,
                    _force_hw_tile=None):
    """Channel attention.
    x: (B, C, H, W); w1: (C//r, C), b1: (C//r,); w2: (C, C//r), b2: (C,).
    Returns (B, C, H, W) in x.dtype."""
    B, C, H, W = x.shape
    Cr = w1.shape[0]
    HW = H * W
    dtype = x.dtype
    itemsize = jnp.dtype(dtype).itemsize

    x_flat = x.reshape(B, C, HW)

    # Keep weights in bf16 for bf16 inputs (bf16 MXU path); f32 otherwise.
    w_dtype = dtype if jnp.dtype(dtype) == jnp.dtype(jnp.bfloat16) else jnp.float32
    w1t = jnp.transpose(w1).astype(w_dtype)          # (C, Cr)
    w2t = jnp.transpose(w2).astype(w_dtype)          # (Cr, C)
    b1r = b1.reshape(1, Cr).astype(jnp.float32)
    b2r = b2.reshape(1, C).astype(jnp.float32)
    weight_bytes = ((w1t.size + w2t.size) * jnp.dtype(w_dtype).itemsize
                    + (b1r.size + b2r.size) * 4)

    vmem_limit = _vmem_limit_bytes()
    target = vmem_limit // 6        # 2 bufs x (in + out) ~ 4x block, + headroom
    per_batch = C * HW * itemsize

    def _cparams(sem):
        return pltpu.CompilerParams(dimension_semantics=sem,
                                    vmem_limit_bytes=vmem_limit)

    use_fused = not _force_two_phase
    bt = 1
    if use_fused:
        bt = _pick_batch_tile(B, per_batch, target)
        # Explicit budget guard: double-buffered in+out blocks + weights must
        # fit the scoped limit, otherwise fall back to the two-phase path.
        if 4 * bt * per_batch + 2 * weight_bytes + (2 << 20) > vmem_limit:
            use_fused = False

    if use_fused:
        chunk = max(512, _round_up(pl.cdiv(HW, 8), 128))
        cost = pl.CostEstimate(
            flops=int(2 * B * C * HW + 4 * B * C * Cr),
            transcendentals=int(B * C),
            bytes_accessed=int(2 * B * C * HW * itemsize + weight_bytes))
        out_flat = pl.pallas_call(
            functools.partial(_ca_fused_kernel, chunk=chunk),
            out_shape=jax.ShapeDtypeStruct((B, C, HW), dtype),
            grid_spec=pltpu.PrefetchScalarGridSpec(
                num_scalar_prefetch=0,
                grid=(B // bt,),
                in_specs=[
                    pl.BlockSpec((bt, C, HW), lambda b: (b, 0, 0)),
                    pl.BlockSpec((C, Cr), lambda b: (0, 0)),
                    pl.BlockSpec((1, Cr), lambda b: (0, 0)),
                    pl.BlockSpec((Cr, C), lambda b: (0, 0)),
                    pl.BlockSpec((1, C), lambda b: (0, 0)),
                ],
                out_specs=pl.BlockSpec((bt, C, HW), lambda b: (b, 0, 0)),
            ),
            compiler_params=_cparams(("parallel",)),
            cost_estimate=cost,
        )(x_flat, w1t, b1r, w2t, b2r)
        return out_flat.reshape(B, C, H, W)

    # ------------- two-phase: HW-tiled pool + MLP, then HW-tiled scale -------------
    hw_tile = _force_hw_tile
    if hw_tile is None:
        hw_tile = max(128, (target // max(C * itemsize, 1)) // 128 * 128)
    hw_tile = min(hw_tile, _round_up(HW, 128))
    n_hw = pl.cdiv(HW, hw_tile)
    chunk = max(512, _round_up(pl.cdiv(hw_tile, 8), 128))

    # Pass 1: per-(b, channel) spatial sums -> MLP -> sigmoid gate.
    cost1 = pl.CostEstimate(
        flops=int(B * C * HW + 4 * B * C * Cr),
        transcendentals=int(B * C),
        bytes_accessed=int(B * C * HW * itemsize + weight_bytes + B * C * 4))
    gate = pl.pallas_call(
        functools.partial(_ca_pool_mlp_kernel, hw_true=HW, chunk=chunk),
        out_shape=jax.ShapeDtypeStruct((B, 1, C), jnp.float32),
        grid_spec=pltpu.PrefetchScalarGridSpec(
            num_scalar_prefetch=0,
            grid=(B, n_hw),
            in_specs=[
                pl.BlockSpec((1, C, hw_tile), lambda b, h: (b, 0, h)),
                pl.BlockSpec((C, Cr), lambda b, h: (0, 0)),
                pl.BlockSpec((1, Cr), lambda b, h: (0, 0)),
                pl.BlockSpec((Cr, C), lambda b, h: (0, 0)),
                pl.BlockSpec((1, C), lambda b, h: (0, 0)),
            ],
            out_specs=pl.BlockSpec((1, 1, C), lambda b, h: (b, 0, 0)),
            scratch_shapes=[pltpu.VMEM((1, C), jnp.float32)],
        ),
        compiler_params=_cparams(("parallel", "arbitrary")),
        cost_estimate=cost1,
    )(x_flat, w1t, b1r, w2t, b2r)

    gate = gate.reshape(B, C, 1)      # (B,1,C) and (B,C,1) share a linear layout

    # Pass 2: stream x once more, multiplying by the per-channel gate.
    cost2 = pl.CostEstimate(
        flops=int(B * C * HW),
        transcendentals=0,
        bytes_accessed=int(2 * B * C * HW * itemsize + B * C * 4))
    out_flat = pl.pallas_call(
        _ca_scale_kernel,
        out_shape=jax.ShapeDtypeStruct((B, C, HW), dtype),
        grid_spec=pltpu.PrefetchScalarGridSpec(
            num_scalar_prefetch=0,
            grid=(B, n_hw),
            in_specs=[
                pl.BlockSpec((1, C, hw_tile), lambda b, h: (b, 0, h)),
                pl.BlockSpec((1, C, 1), lambda b, h: (b, 0, 0)),
            ],
            out_specs=pl.BlockSpec((1, C, hw_tile), lambda b, h: (b, 0, h)),
        ),
        compiler_params=_cparams(("parallel", "parallel")),
        cost_estimate=cost2,
    )(x_flat, gate)
    return out_flat.reshape(B, C, H, W)


def ca_layer_ref(x, w1, b1, w2, b2):
    """Pure-JAX f32 reference mirroring the PyTorch module."""
    xf = x.astype(jnp.float32)
    y = jnp.mean(xf, axis=(2, 3), keepdims=True)                       # (B,C,1,1)
    y = jnp.einsum('oc,bcij->boij', w1.astype(jnp.float32), y) \
        + b1.astype(jnp.float32)[None, :, None, None]
    y = jnp.maximum(y, 0.0)
    y = jnp.einsum('oc,bcij->boij', w2.astype(jnp.float32), y) \
        + b2.astype(jnp.float32)[None, :, None, None]
    y = jax.nn.sigmoid(y)
    return xf * y


if __name__ == "__main__":
    key = jax.random.PRNGKey(0)
    kx, k1, k2, k3, k4 = jax.random.split(key, 5)

    B, C, reduction = 2, 16, 8
    Cr = C // reduction

    # Synthetic parameters (shapes from nn.Conv2d(C, C//r, 1, bias=True))
    w1 = jax.random.normal(k1, (Cr, C), dtype=jnp.float32) * 0.1
    b1 = jax.random.normal(k2, (Cr,), dtype=jnp.float32) * 0.1
    w2 = jax.random.normal(k3, (C, Cr), dtype=jnp.float32) * 0.1
    b2 = jax.random.normal(k4, (C,), dtype=jnp.float32) * 0.1

    # 1) Fused path, HW a multiple of 128.
    x = jax.random.normal(kx, (B, C, 16, 16), dtype=jnp.float32)
    out = ca_layer_pallas(x, w1, b1, w2, b2)
    jax.block_until_ready(out)
    ref = ca_layer_ref(x, w1, b1, w2, b2)
    assert out.shape == ref.shape, "shape mismatch vs reference"
    assert jnp.allclose(out, ref, atol=1e-5, rtol=1e-5), "fused path mismatch"

    # 2) Fused path, ragged HW (no wrapper pad/slice; masked tail stores).
    x2 = jax.random.normal(kx, (B, C, 15, 15), dtype=jnp.float32)
    out2 = ca_layer_pallas(x2, w1, b1, w2, b2)
    ref2 = ca_layer_ref(x2, w1, b1, w2, b2)
    assert jnp.allclose(out2, ref2, atol=1e-5, rtol=1e-5), "ragged-HW mismatch"

    # 3) Two-phase path (forced, small HW tile) on the ragged shape.
    out3 = ca_layer_pallas(x2, w1, b1, w2, b2,
                           _force_two_phase=True, _force_hw_tile=128)
    assert jnp.allclose(out3, ref2, atol=1e-5, rtol=1e-5), "two-phase mismatch"

    # 4) bf16 fused path (bf16 MXU weights, f32 accumulation).
    xb = x.astype(jnp.bfloat16)
    outb = ca_layer_pallas(xb, w1, b1, w2, b2)
    refb = ca_layer_ref(xb, w1, b1, w2, b2)
    assert jnp.allclose(outb.astype(jnp.float32), refb,
                        atol=5e-2, rtol=5e-2), "bf16 mismatch"

    jax.block_until_ready((out, out2, out3, outb))
    print("KERNEL_OK")
</pallas_src>

<mosaic_0001>
module attributes {stable_mosaic.version = 11 : i64} {
  func.func @_ca_fused_kernel(%arg0: i32, %arg1: memref<1x16x256xf32, #tpu.memory_space<vmem>>, %arg2: memref<16x2xf32, #tpu.memory_space<vmem>>, %arg3: memref<1x2xf32, #tpu.memory_space<vmem>>, %arg4: memref<2x16xf32, #tpu.memory_space<vmem>>, %arg5: memref<1x16xf32, #tpu.memory_space<vmem>>, %arg6: memref<1x16x256xf32, #tpu.memory_space<vmem>>) attributes {dimension_semantics = [#tpu.dimension_semantics<parallel>], iteration_bounds = array<i64: 2>, scalar_prefetch = 0 : i64, scratch_operands = 0 : i64, tpu.core_type = #tpu.core_type<tc>, window_params = [{transform_indices = @transform_0, window_bounds = array<i64: 1, 16, 256>}, {pipeline_mode = #tpu.pipeline_mode<synchronous>, transform_indices = @transform_1, window_bounds = array<i64: 16, 2>}, {pipeline_mode = #tpu.pipeline_mode<synchronous>, transform_indices = @transform_2, window_bounds = array<i64: 1, 2>}, {pipeline_mode = #tpu.pipeline_mode<synchronous>, transform_indices = @transform_3, window_bounds = array<i64: 2, 16>}, {pipeline_mode = #tpu.pipeline_mode<synchronous>, transform_indices = @transform_4, window_bounds = array<i64: 1, 16>}, {transform_indices = @transform_5, window_bounds = array<i64: 1, 16, 256>}]} {
    %cst = arith.constant 0.000000e+00 : f32
    %0 = vector.broadcast %cst : f32 to vector<1x16xf32>
    %c0 = arith.constant 0 : index
    %c0_0 = arith.constant 0 : index
    %c0_1 = arith.constant 0 : index
    %1 = vector.load %arg1[%c0, %c0_0, %c0_1] : memref<1x16x256xf32, #tpu.memory_space<vmem>>, vector<1x16x256xf32>
    %cst_2 = arith.constant dense<0.000000e+00> : vector<1x16xf32>
    %2 = vector.multi_reduction <add>, %1, %cst_2 [2] : vector<1x16x256xf32> to vector<1x16xf32>
    %3 = arith.addf %0, %2 : vector<1x16xf32>
    %cst_3 = arith.constant 3.906250e-03 : f32
    %4 = vector.broadcast %cst_3 : f32 to vector<1x16xf32>
    %5 = arith.mulf %3, %4 : vector<1x16xf32>
    %c0_4 = arith.constant 0 : index
    %c0_5 = arith.constant 0 : index
    %6 = vector.load %arg2[%c0_4, %c0_5] : memref<16x2xf32, #tpu.memory_space<vmem>>, vector<16x2xf32>
    %cst_6 = arith.constant dense<0.000000e+00> : vector<1x2xf32>
    %7 = tpu.matmul %5, %6, %cst_6 {dimension_numbers = #tpu.dot_dimension_numbers<[1], [0], [0], [1], [0, 0, 1, 1], [], []>} : vector<1x16xf32>, vector<16x2xf32>, vector<1x2xf32> -> vector<1x2xf32>
    %c0_7 = arith.constant 0 : index
    %c0_8 = arith.constant 0 : index
    %8 = vector.load %arg3[%c0_7, %c0_8] : memref<1x2xf32, #tpu.memory_space<vmem>>, vector<1x2xf32>
    %9 = arith.addf %7, %8 : vector<1x2xf32>
    %cst_9 = arith.constant 0.000000e+00 : f32
    %10 = vector.broadcast %cst_9 : f32 to vector<1x2xf32>
    %11 = arith.maximumf %9, %10 : vector<1x2xf32>
    %c0_10 = arith.constant 0 : index
    %c0_11 = arith.constant 0 : index
    %12 = vector.load %arg4[%c0_10, %c0_11] : memref<2x16xf32, #tpu.memory_space<vmem>>, vector<2x16xf32>
    %cst_12 = arith.constant dense<0.000000e+00> : vector<1x16xf32>
    %13 = tpu.matmul %11, %12, %cst_12 {dimension_numbers = #tpu.dot_dimension_numbers<[1], [0], [0], [1], [0, 0, 1, 1], [], []>} : vector<1x2xf32>, vector<2x16xf32>, vector<1x16xf32> -> vector<1x16xf32>
    %c0_13 = arith.constant 0 : index
    %c0_14 = arith.constant 0 : index
    %14 = vector.load %arg5[%c0_13, %c0_14] : memref<1x16xf32, #tpu.memory_space<vmem>>, vector<1x16xf32>
    %15 = arith.addf %13, %14 : vector<1x16xf32>
    %16 = arith.negf %15 : vector<1x16xf32>
    %17 = math.exp %16 : vector<1x16xf32>
    %cst_15 = arith.constant 1.000000e+00 : f32
    %18 = vector.broadcast %cst_15 : f32 to vector<1x16xf32>
    %19 = arith.addf %18, %17 : vector<1x16xf32>
    %20 = arith.divf %18, %19 : vector<1x16xf32>
    %21 = vector.shape_cast %20 : vector<1x16xf32> to vector<1x16x1xf32>
    %c0_16 = arith.constant 0 : index
    %c0_17 = arith.constant 0 : index
    %c0_18 = arith.constant 0 : index
    %22 = vector.load %arg1[%c0_16, %c0_17, %c0_18] : memref<1x16x256xf32, #tpu.memory_space<vmem>>, vector<1x16x256xf32>
    %23 = vector.broadcast %21 : vector<1x16x1xf32> to vector<1x16x256xf32>
    %24 = arith.mulf %22, %23 : vector<1x16x256xf32>
    %c0_19 = arith.constant 0 : index
    %c0_20 = arith.constant 0 : index
    %c0_21 = arith.constant 0 : index
    %25 = vector.load %arg6[%c0_19, %c0_20, %c0_21] : memref<1x16x256xf32, #tpu.memory_space<vmem>>, vector<1x16x256xf32>
    tpu.vector_store %arg6[%c0_19, %c0_20, %c0_21], %24 {strides = array<i32>} : memref<1x16x256xf32, #tpu.memory_space<vmem>>, vector<1x16x256xf32>,
    return
  }
  func.func @transform_0(%arg0: i32) -> (i32, i32, i32) {
    %c0_i32 = arith.constant 0 : i32
    %c0_i32_0 = arith.constant 0 : i32
    %c0_i32_1 = arith.constant 0 : i32
    return %arg0, %c0_i32, %c0_i32_0 : i32, i32, i32
  }
  func.func @transform_1(%arg0: i32) -> (i32, i32) {
    %c0_i32 = arith.constant 0 : i32
    %c0_i32_0 = arith.constant 0 : i32
    %c0_i32_1 = arith.constant 0 : i32
    return %c0_i32, %c0_i32_0 : i32, i32
  }
  func.func @transform_2(%arg0: i32) -> (i32, i32) {
    %c0_i32 = arith.constant 0 : i32
    %c0_i32_0 = arith.constant 0 : i32
    %c0_i32_1 = arith.constant 0 : i32
    return %c0_i32, %c0_i32_0 : i32, i32
  }
  func.func @transform_3(%arg0: i32) -> (i32, i32) {
    %c0_i32 = arith.constant 0 : i32
    %c0_i32_0 = arith.constant 0 : i32
    %c0_i32_1 = arith.constant 0 : i32
    return %c0_i32, %c0_i32_0 : i32, i32
  }
  func.func @transform_4(%arg0: i32) -> (i32, i32) {
    %c0_i32 = arith.constant 0 : i32
    %c0_i32_0 = arith.constant 0 : i32
    %c0_i32_1 = arith.constant 0 : i32
    return %c0_i32, %c0_i32_0 : i32, i32
  }
  func.func @transform_5(%arg0: i32) -> (i32, i32, i32) {
    %c0_i32 = arith.constant 0 : i32
    %c0_i32_0 = arith.constant 0 : i32
    %c0_i32_1 = arith.constant 0 : i32
    return %arg0, %c0_i32, %c0_i32_0 : i32, i32, i32
  }
}

</mosaic_0001>

<bundles_post_ra>
// kernel: tpu_custom_call.1
= control target key start
LH: loop header
LB: loop body
LE: loop exit
PB: predicated region body
PF: predicated region fallthrough
CT: control target
= control target key end

     0   :  { %10 = vsyncpa [#allocation3], 0  ;;  %s964_s0 = inlined_call_operand.hbm [shape: f32[2,16,256], index: 0, kind: input, shape index: {}]   ;;  %s965_s1 = inlined_call_operand.vmem [shape: f32[16,2], index: 1, kind: input, shape index: {}]   ;;  %s966_s2 = inlined_call_operand.vmem [shape: f32[1,2], index: 2, kind: input, shape index: {}]   ;;  %s967_s3 = inlined_call_operand.vmem [shape: f32[2,16], index: 3, kind: input, shape index: {}]   ;;  %s968_s4 = inlined_call_operand.vmem [shape: f32[1,16], index: 4, kind: input, shape index: {}]   ;;  %s969_s5 = inlined_call_operand.hbm [shape: f32[2,16,256], index: 5, kind: output, shape index: {}]  }
   0x1   :  { %12 = vsyncpa [#allocation3 + $0x1], 0 }
   0x2   :  { %13 = vsyncpa [#allocation4], 0 }
   0x3   :  { %15 = vsyncpa [#allocation4 + $0x1], 0  ;;  %s775_s18 = smov 0   ;;  %s777_s19 = smov 0  }
   0x4   :  { %s779_s20 = smov 0   ;;  %s781_s21 = smov 0  }
   0x5 LB: > { %s796_s22 = sadd.s32 4294967295, %s734_s21   ;;  %s541_s23 = sadd.s32 4294967294, %s734_s21   ;;  %s734_s21 = sphi %s781_s21, %s982_s21   ;;  %s730_s20 = sphi %s779_s20, %s981_s20   ;;  %s726_s19 = sphi %s777_s19, %s980_s19   ;;  %s722_s18 = sphi %s775_s18, %s979_s18  }
   0x6   : > { %s800_s24 = sadd.s32 1, %s734_s21   ;;  %s28_s25 = sadd.s32 1, %s730_s20 }
   0x7   : > { %s25_s26 = ssub.s32 %s734_s21, %s800_s24  ;;  %p35_p0 = scmp.ne.s32.totalorder %s730_s20, %s726_s19 }
   0x8   : > { %p26_p1 = scmp.eq.s32.totalorder %s25_s26, 0  ;;  %p36_p2 = scmp.eq.s32.totalorder %s734_s21, 0 }
   0x9   : > { %p41_p3 = scmp.ne.s32.totalorder %s726_s19, %s722_s18  ;;  %p42_p4 = scmp.eq.s32.totalorder %s796_s22, 0 }
   0xa   : > { %s812_s27 = scalar_select %p26_p1, %s730_s20, %s28_s25  }
   0xb   : > { %p814_p5 = por %p36_p2, %p35_p0  ;;  %p818_p6 = por %p42_p4, %p41_p3 }
   0xc   : > { %p149_p7 = scmp.eq.s32.totalorder %s796_s22, 1  ;;  %p155_p8 = scmp.eq.s32.totalorder %s541_s23, 1 }
   0xd   : > { %p593_p10 = scmp.lt.s32.totalorder %s734_s21, 2  ;;  %s187_s7 = sand.u32 1, %s730_s20  }
   0xe   : > { %p825_p11 = por %p149_p7, %p35_p0  ;;  %p829_p12 = por %p155_p8, %p41_p3 }
   0xf   : > { %s559_s8 = sshll.u32 %s734_s21, 9  ;;  %s544_s9 = sshll.u32 %s187_s7, 5 }
  0x10   : > { %s973_s30 = scalar_select %p825_p11, 1, 0 }
  0x11   : > { %s974_s6 = scalar_select %p829_p12, 1, 0 }
  0x12   : > { %s838_s12 = scalar_lea.hbm %s964_s0, %s559_s8  ;;  %s191_s13 = scalar_lea.vmem [#allocation2], %s544_s9 }
  0x13   : > { %s198_s14 = sshll.u32 %s191_s13, 4  ;;  %p842_p13 = pnand %p593_p10, %p814_p5  ;;  %s846_s14 = int_to_ptr.vmem [resolvable:$true] %s198_s14 }
  0x14   : > { %s848_s16 = scalar_lea.sflag [#allocation3], %s187_s7  ;;  %s638_s17 = scalar_lea.hbm %s838_s12, 512 }
  0x15   : > { %p639_p0 = scmp.ne.s32.totalorder %s838_s12, %s638_s17  ;;  %p640_p1 = pneg %p842_p13 }
  0x16   : > { %s643_s26 = scalar_lea.hbm %s964_s0, 1024  ;;  %p644_p4 = scmp.lt.u32.totalorder %s838_s12, %s964_s0 }
  0x17   : > { %p641_p2 = pnand %p640_p1, %p639_p0  ;;  %p645_p5 = scmp.lt.u32.totalorder %s643_s26, %s638_s17 }
  0x18   : > { %p647_p8 = scmp.lt.u32.totalorder %s638_s17, %s838_s12 }
  0x19   : > { %p642_p3 = pneg %p641_p2  ;;  %p646_p7 = por %p645_p5, %p644_p4 }
  0x1b   : > { %p648_p10 = por %p647_p8, %p646_p7 }
  0x1d   : > { %p649_p9 = pnand %p648_p10, %p642_p3 }
  0x1f   : > { %652 = shalt.err (!%p649_p9)
}
  0x20   : > { %s653_s7 = scalar_lea.vmem %s846_s14, 512  ;;  %s736_s9 = smov [#allocation2]  }
  0x21   : > { %p654_p0 = scmp.ne.s32.totalorder %s846_s14, %s653_s7  ;;  %s658_s10 = sshll.u32 %s736_s9, 4  ;;  %s659_s10 = int_to_ptr.vmem [resolvable:$false] %s658_s10 }
  0x22   : > { %s660_s11 = scalar_lea.vmem %s659_s10, 1024  ;;  %p661_p11 = scmp.lt.s32.totalorder %s846_s14, %s659_s10 }
  0x23   : > { %p656_p2 = pnand %p654_p0, %p640_p1  ;;  %p662_p4 = scmp.lt.s32.totalorder %s660_s11, %s653_s7 }
  0x25   : > { %p657_p12 = pneg %p656_p2  ;;  %p663_p5 = por %p662_p4, %p661_p11 }
  0x27   : > { %p664_p7 = pnand %p663_p5, %p657_p12 }
  0x29   : > { %667 = shalt.err (!%p664_p7)
}
  0x2a   : > { %s737_s13 = smov 256   ;;  %s738_s17 = smov 16  }
  0x2b   : > { %588 = dma.hbm_to_vmem [thread:$0]  (!%p842_p13), %s838_s12, 512, %s846_s14, %s848_s16, %s737_s13, %s737_s13, %s738_s17  }
  0x2c   : > { %p547_p9 = scmp.ge.s32.totalorder %s734_s21, 1  ;;  %p206_p1 = scmp.lt.s32.totalorder %s734_s21, 3 }
  0x2e   : > { %p207_p3 = pnand %p547_p9, %p206_p1 }
  0x2f   : > { %s879_s23 = sand.u32 (!%p207_p3), 1, %s726_s19  }
  0x30   : > { %210 = sbr.rel (%p207_p3) target bundleno = 804 (0x324), region = 40  ;;  %s548_s25 = sshll.u32 (!%p207_p3), %s879_s23, 5 }
  0x31   : > { %s213_s26 = scalar_lea.sflag (!%p207_p3), [#allocation3], %s879_s23  ;;  %s216_s28 = scalar_lea.vmem (!%p207_p3), [#allocation2], %s548_s25 }
  0x37   : > { %713 = dma.done.wait (%p818_p6), %s213_s26, 512  }
  0x38   : > { %715 = vsyncadd (%p818_p6), %s213_s26, 4294966784  ;;  %v243_v0 = vld [vmem:[%s216_s28] sm:$0xff]  ;;  %v244_v1 = vld [vmem:[%s216_s28 + $0x8] sm:$0xff]  ;;  %v739_v9 = vmov 0.0|0.0   ;;  %vm740_vm0 = vmmov 0   ;;  %v741_v10 = vmov 0.0   ;;  %v262_v11 = vlaneseq }
  0x39   : > { %v889_v2 = vld [vmem:[%s216_s28 + $0x10] sm:$0xff]  ;;  %v247_v3 = vadd.f32 %v244_v1, %v243_v0  ;;  %v891_v4 = vld [vmem:[%s216_s28 + $0x18] sm:$0xff]  ;;  %v257_v6 = vld [vmem:[%s965_s1] sm:$0xff]  ;;  %578 = vmatprep.subr.bf16.mxu0 %v739_v9  ;;  %570 = vmatprep.mubr.msk.f32.mxu0 %vm740_vm0, %v741_v10  ;;  %vm273_vm1 = vcmask 130112   ;;  %vm275_vm2 = vcmask 130048   ;;  %vm355_vm3 = vcmask 1041408  }
  0x3a   : > { %v250_v5 = vadd.f32 %v891_v4, %v889_v2  ;;  %v258_v7 = vld [vmem:[%s965_s1 + $0x8] sm:$0xff]  ;;  %573 = vmatprep.subr.mxu1 %v741_v10  ;;  %575 = vmatprep.mubr.msk.f32.mxu1 %vm740_vm0, %v741_v10  ;;  %v263_v12 = vand.u32 127, %v262_v11  ;;  %v265_v13 = vshrl.u32 %v262_v11, 7  ;;  %v349_v24 = vld [vmem:[%s967_s3] sm:$0x3]  ;;  %vm351_vm4 = vcmask 15360  }
  0x3b   : > { %248 = vadd.xlane.f32.xlu0 %v247_v3  ;;  %v579_v8 = vpack.c.bf16 %v258_v7, %v257_v6  ;;  %574 = vmatpush3.msk.msra.mxu1 %vm355_vm3, %v349_v24  ;;  %v259_v25 = vld [vmem:[%s966_s2] sm:$0x1]  ;;  %s242_s13 = scalar_lea.vmem [#allocation5], %s548_s25  ;;  %s560_s26 = sshll.u32 %s796_s22, 9 }
  0x3c   : > { %v268_v14 = vadd.s32 4294967288, %v263_v12  ;;  %v266_v16 = vsub.s32 %v263_v12, %v265_v13  ;;  %v350_v30 = vld [vmem:[%s968_s4] sm:$0x1]  ;;  %v437_v37 = vsub.s32 0, %v265_v13  ;;  %s468_s17 = sshll.u32 %s242_s13, 4  ;;  %s918_s14 = scalar_lea.hbm %s969_s5, %s560_s26  ;;  %s913_s17 = int_to_ptr.vmem [resolvable:$true] %s468_s17 }
  0x3d   : > { %580 = vmatpush3.bf16.msra.mxu0 %v579_v8  ;;  %s455_s22 = scalar_lea.sflag [#allocation4], %s879_s23  ;;  %s668_s25 = scalar_lea.vmem %s913_s17, 512 }
  0x3e   : > { %v271_v18 = vsub.s32 %v268_v14, %v265_v13  ;;  %p669_p6 = scmp.ne.s32.totalorder %s913_s17, %s668_s25  ;;  %p976_p11 = scmp.ne.s32.totalorder %s973_s30, 0 }
  0x3f   : > { %251 = vadd.xlane.f32.xlu0 %v250_v5  ;;  %s742_s15 = smov [#allocation5]  }
  0x40   : > { %p670_p12 = pnand %p669_p6, %p976_p11  ;;  %s672_s16 = sshll.u32 %s742_s15, 4  ;;  %s673_s16 = int_to_ptr.vmem [resolvable:$false] %s672_s16 }
  0x41   : > { %s674_s29 = scalar_lea.vmem %s673_s16, 1024  ;;  %p675_p8 = scmp.lt.s32.totalorder %s913_s17, %s673_s16 }
  0x42   : > { %p671_p13 = pneg %p670_p12  ;;  %p676_p10 = scmp.lt.s32.totalorder %s674_s29, %s668_s25 }
  0x44   : > { %p677_p0 = por %p676_p10, %p675_p8 }
  0x46   : > { %p678_p2 = pnand %p677_p0, %p671_p13 }
  0xc8   : > { %v249_v15 = vpop.xlane.xlu0 %248 }
  0xc9   : > { %v255_v17 = vmul.f32 0.00390625, %v249_v15 }
  0xcb   : > { %v267_v21 = vrot.slane %v255_v17, %v266_v16 }
  0xcc   : > { %v252_v19 = vpop.xlane.xlu0 %251 }
  0xcd   : > { %v256_v20 = vmul.f32 0.00390625, %v252_v19 }
  0xcf   : > { %v272_v22 = vrot.slane %v256_v20, %v271_v18 }
  0xd1   : > { %v274_v23 = vsel %vm273_vm1, %v272_v22, %v267_v21 }
  0xd2   : > { %571 = vmatmul.mubr.msk.f32.vlgmr.msra.gmra.mrb[0].mxu0 %vm275_vm2, %v274_v23 }
 0x1a5   : > { %v344_v26 = vpop.f32.mrb[0].mxu0 }
 0x1a6   : > { %v345_v27 = vadd.f32 %v344_v26, %v259_v25  ;;  %v572_v28 = vpop.f32.mrb[1].mxu0 }
 0x1a8   : > { %v348_v29 = vmax.f32 %v345_v27, 0.0 }
 0x1aa   : > { %576 = vmatmul.mubr.msk.f32.vlgmr.msra.gmra.mrb[0].mxu1 %vm351_vm4, %v348_v29 }
 0x27d   : > { %v425_v31 = vpop.f32.mrb[0].mxu1 }
 0x27e   : > { %v426_v32 = vadd.f32 %v425_v31, %v350_v30  ;;  %v577_v33 = vpop.f32.mrb[1].mxu1 }
 0x280   : > { %v553_v34 = vmul.f32 -1.442695, %v426_v32 }
 0x282   : > { %634 = vpow2.f32 %v553_v34 }
 0x28c   : > { %v635_v35 = vpop.eup %634 }
 0x28d   : > { %v432_v36 = vadd.f32 1.0, %v635_v35 }
 0x28f   : > { %636 = vrcp.f32 %v432_v36 }
 0x299   : > { %v637_v38 = vpop.eup %636 }
 0x29a   : > { %v438_v39 = vrot.slane %v637_v38, %v437_v37 }
 0x29c   : > { %440 = vbcast.lane.b32.xlu1 %v438_v39, 256 }
 0x2a0   : > { %444 = vbcast.lane.b32.xlu1 %v438_v39, 264 }
 0x30e   : > { %v441_v40 = vpop.permute.xlu1 %440 }
 0x30f   : > { %v446_v41 = vmul.f32 %v441_v40, %v243_v0  ;;  %v447_v42 = vmul.f32 %v441_v40, %v244_v1 }
 0x311   : > { %450 = vst [vmem:[%s242_s13] sm:$0xff] %v446_v41  ;;  %451 = vst [vmem:[%s242_s13 + $0x8] sm:$0xff] %v447_v42 }
 0x312   : > { %v445_v43 = vpop.permute.xlu1 %444 }
 0x313   : > { %v448_v44 = vmul.f32 %v445_v43, %v889_v2  ;;  %v449_v45 = vmul.f32 %v445_v43, %v891_v4 }
 0x315   : > { %452 = vst [vmem:[%s242_s13 + $0x10] sm:$0xff] %v448_v44  ;;  %453 = vst [vmem:[%s242_s13 + $0x18] sm:$0xff] %v449_v45 }
 0x316   : > { %681 = shalt.err (!%p678_p2)
}
 0x317   : > { %s682_s8 = scalar_lea.hbm %s918_s14, 512  ;;  %s686_s10 = scalar_lea.hbm %s969_s5, 1024 }
 0x318   : > { %p683_p4 = scmp.ne.s32.totalorder %s918_s14, %s682_s8  ;;  %p687_p9 = scmp.lt.u32.totalorder %s918_s14, %s969_s5 }
 0x319   : > { %p688_p1 = scmp.lt.u32.totalorder %s686_s10, %s682_s8  ;;  %p690_p6 = scmp.lt.u32.totalorder %s682_s8, %s918_s14 }
 0x31a   : > { %p684_p5 = pnand %p683_p4, %p976_p11 }
 0x31b   : > { %p689_p3 = por %p688_p1, %p687_p9 }
 0x31c   : > { %p685_p7 = pneg %p684_p5 }
 0x31d   : > { %p691_p12 = por %p690_p6, %p689_p3 }
 0x31f   : > { %p692_p13 = pnand %p691_p12, %p685_p7 }
 0x321   : > { %695 = shalt.err (!%p692_p13)
}
 0x322   : > { %s743_s26 = smov 256   ;;  %s744_s28 = smov 16  }
 0x323   : > { %583 = dma.vmem_to_hbm [thread:$0]  (%p976_p11), %s913_s17, 512, %s918_s14, %s455_s22, %s743_s26, %s743_s26, %s744_s28  }
 0x324 PF: > { %s483_s12 = sand.u32 1, %s722_s18   ;;  %p977_p8 = scmp.ne.s32.totalorder %s974_s6, 0 }
 0x325   : > { %p978_p10 = scmp.ge.s32.totalorder %s734_s21, 2  ;;  %s484_s25 = scalar_lea.sflag [#allocation4], %s483_s12 }
 0x327   : > { %p590_p0 = pnand %p978_p10, %p977_p8 }
 0x329   : > { %717 = dma.done.wait (!%p590_p0), %s484_s25, 512  }
 0x32a   : > { %719 = vsyncadd (!%p590_p0), %s484_s25, 4294966784  ;;  %p18_p2 = scmp.ge.s32.totalorder %s800_s24, 4   ;;  %s979_s18 = smov %s726_s19 }
 0x32b   : > { %s980_s19 = smov %s730_s20  ;;  %s981_s20 = smov %s812_s27 }
 0x32c   : > { %s982_s21 = smov %s800_s24  ;;  %20 = sbr.rel (!%p18_p2) target bundleno = 5 (0x5), region = 85 }
 0x333   :  { %489 = vsyncpa [#allocation3], 1 }
 0x334   :  { %491 = vsyncpa [#allocation3 + $0x1], 1 }
 0x335   :  { %492 = vsyncpa [#allocation4], 1 }
 0x336   :  { %494 = vsyncpa [#allocation4 + $0x1], 1 }

</bundles_post_ra>
